<compile_context>
chip_gen: v6e
topology: v6e:2x2x1
jax: 0.10.0
libtpu: 0.0.40
codegen_flags: <defaults>
</compile_context>

<pallas_src>
import jax
import jax.numpy as jnp
from jax.experimental import pallas as pl
from jax.experimental.pallas import tpu as pltpu

LN_EPS = 1e-5  # nn.LayerNorm default


def _downsample_kernel(x_ref, w_ref, b_ref, o_ref):
    # x_ref: (4, Cin, T)    tap-major (k = kh*2 + kw), channels x output rows
    # w_ref: (4, Cout, Cin) conv weight per 2x2 tap, LayerNorm gamma folded in
    # b_ref: (Cout, 1)      conv bias with LayerNorm beta folded in
    # o_ref: (Cout, T)      output rows of this (batch, row-tile), NCHW layout
    cout, t = o_ref.shape
    mm_dtype = jnp.bfloat16 if w_ref.dtype == jnp.bfloat16 else jnp.float32

    def tap(k, acc):
        c = x_ref[k].astype(jnp.float32)                 # (Cin, T)
        mu = jnp.mean(c, axis=0, keepdims=True)          # (1, T)
        d = c - mu
        var = jnp.mean(d * d, axis=0, keepdims=True)     # two-pass variance
        z = d * jax.lax.rsqrt(var + LN_EPS)              # (Cin, T)
        return acc + jnp.dot(w_ref[k].astype(mm_dtype), z.astype(mm_dtype),
                             preferred_element_type=jnp.float32)

    acc = jax.lax.fori_loop(0, 4, tap, jnp.zeros((cout, t), jnp.float32),
                            unroll=True)
    o_ref[...] = (acc + b_ref[...].astype(jnp.float32)).astype(o_ref.dtype)


def _vmem_capacity():
    try:
        return int(pltpu.get_tpu_info().vmem_capacity_bytes)
    except Exception:
        return 64 << 20  # conservative (v7x per-core VMEM)


def _pick_rows(R, B, cin, cout, in_bytes, out_bytes, budget_bytes):
    """Row tile: multiple of 128 (or full extent) fitting the VMEM budget."""
    if R <= 128:
        return R  # single full-extent block per batch (always layout-legal)
    per_row = (2 * 4 * cin * in_bytes      # input block, double buffered
               + 2 * cout * out_bytes      # output block, double buffered
               + 4 * cin * 4               # f32 temporaries (c, d, z, slack)
               + cout * 4)                 # f32 accumulator
    t = (budget_bytes // max(per_row, 1)) // 128 * 128
    t = int(max(128, min(t, (R // 128) * 128)))
    # keep >= ~4 total grid steps (when there is enough work) so the pipeline
    # has something to prefetch and v7x's two TensorCores both get blocks
    while t > 128 and B * ((R + t - 1) // t) < 4:
        t -= 128
    return t


def downsample(x, gamma, beta, conv_w, conv_b):
    """DownSample forward: LayerNorm2d(Cin) then Conv2d(Cin->Cout, k=2, s=2).

    x: (B, Cin, H, W) NCHW; returns (B, Cout, H//2, W//2) NCHW.
    """
    B, Cin, H, W = x.shape
    Cout = conv_w.shape[0]
    Ho, Wo = H // 2, W // 2
    R = Ho * Wo
    out_dtype = x.dtype

    # ---- single host-side layout pass: NCHW -> (4, B, Cin, Ho*Wo) ----
    # p[kh*2+kw, b, cin, ho*Wo+wo] = x[b, cin, 2*ho+kh, 2*wo+kw]
    x6 = x[:, :, :2 * Ho, :2 * Wo].reshape(B, Cin, Ho, 2, Wo, 2)
    p = jnp.transpose(x6, (3, 5, 0, 1, 2, 4)).reshape(4, B, Cin, R)

    # ---- fold the LayerNorm affine into the conv params (host side) ----
    wf = conv_w.astype(jnp.float32)
    w_all = (wf * gamma.astype(jnp.float32)[None, :, None, None])
    w_all = jnp.transpose(w_all, (2, 3, 0, 1)).reshape(4, Cout, Cin)
    w_all = w_all.astype(conv_w.dtype)
    b_all = (conv_b.astype(jnp.float32)
             + jnp.einsum('oikl,i->o', wf, beta.astype(jnp.float32)))
    b_all = b_all.reshape(Cout, 1)

    in_bytes = jnp.dtype(p.dtype).itemsize
    out_bytes = jnp.dtype(out_dtype).itemsize
    w_bytes = jnp.dtype(w_all.dtype).itemsize

    vmem_cap = _vmem_capacity()
    vmem_limit = int(min(vmem_cap * 0.8, 110 * 1024 * 1024))
    vmem_limit = max(vmem_limit, 32 * 1024 * 1024)
    fixed = 2 * 4 * Cout * Cin * w_bytes + 2 * Cout * 4 + (4 << 20)
    budget = max(8 << 20, vmem_limit - fixed)

    t = _pick_rows(R, B, Cin, Cout, in_bytes, out_bytes, budget)
    nt = pl.cdiv(R, t)

    cost = pl.CostEstimate(
        flops=2 * 4 * Cin * Cout * B * R + 8 * 4 * Cin * B * R,
        transcendentals=4 * B * R,
        bytes_accessed=(4 * B * R * Cin * in_bytes
                        + B * R * Cout * out_bytes
                        + 4 * Cout * Cin * w_bytes),
    )

    out = pl.pallas_call(
        _downsample_kernel,
        out_shape=jax.ShapeDtypeStruct((B, Cout, R), out_dtype),
        grid_spec=pltpu.PrefetchScalarGridSpec(
            num_scalar_prefetch=0,
            grid=(B, nt),
            in_specs=[
                pl.BlockSpec((4, None, Cin, t), lambda b, i: (0, b, 0, i)),
                pl.BlockSpec((4, Cout, Cin), lambda b, i: (0, 0, 0)),
                pl.BlockSpec((Cout, 1), lambda b, i: (0, 0)),
            ],
            out_specs=pl.BlockSpec((None, Cout, t), lambda b, i: (b, 0, i)),
        ),
        compiler_params=pltpu.CompilerParams(
            dimension_semantics=("parallel", "parallel"),
            vmem_limit_bytes=vmem_limit,
        ),
        cost_estimate=cost,
    )(p, w_all, b_all)

    # (B, Cout, Ho*Wo) -> (B, Cout, Ho, Wo): zero-copy split, no transpose.
    return out.reshape(B, Cout, Ho, Wo)


def _reference(x, gamma, beta, conv_w, conv_b):
    # pure-JAX reference mirroring the PyTorch module
    xn = jnp.transpose(x, (0, 2, 3, 1))
    mu = xn.mean(-1, keepdims=True)
    var = ((xn - mu) ** 2).mean(-1, keepdims=True)
    xn = (xn - mu) / jnp.sqrt(var + LN_EPS) * gamma + beta
    xn = jnp.transpose(xn, (0, 3, 1, 2))
    out = jax.lax.conv_general_dilated(
        xn, conv_w, window_strides=(2, 2), padding="VALID",
        dimension_numbers=("NCHW", "OIHW", "NCHW"))
    return out + conv_b[None, :, None, None]


if __name__ == "__main__":
    B, Cin, Cout, H, W = 2, 4, 8, 16, 16

    key = jax.random.PRNGKey(0)
    k1, k2, k3, k4, k5 = jax.random.split(key, 5)
    x = jax.random.normal(k1, (B, Cin, H, W), jnp.float32)
    conv_w = 0.1 * jax.random.normal(k2, (Cout, Cin, 2, 2), jnp.float32)
    conv_b = 0.1 * jax.random.normal(k3, (Cout,), jnp.float32)
    gamma = 1.0 + 0.1 * jax.random.normal(k4, (Cin,), jnp.float32)
    beta = 0.1 * jax.random.normal(k5, (Cin,), jnp.float32)

    out = downsample(x, gamma, beta, conv_w, conv_b)
    out = jax.block_until_ready(out)

    ref = _reference(x, gamma, beta, conv_w, conv_b)
    assert out.shape == (B, Cout, H // 2, W // 2), out.shape
    assert jnp.allclose(out, ref, atol=1e-4, rtol=1e-4), float(jnp.abs(out - ref).max())

    print("KERNEL_OK")
</pallas_src>

<mosaic_0001>
module attributes {stable_mosaic.version = 11 : i64} {
  func.func @_downsample_kernel(%arg0: i32, %arg1: i32, %arg2: memref<4x1x4x64xf32, #tpu.memory_space<vmem>>, %arg3: memref<4x8x4xf32, #tpu.memory_space<vmem>>, %arg4: memref<8x1xf32, #tpu.memory_space<vmem>>, %arg5: memref<1x8x64xf32, #tpu.memory_space<vmem>>) attributes {dimension_semantics = [#tpu.dimension_semantics<parallel>, #tpu.dimension_semantics<parallel>], iteration_bounds = array<i64: 2, 1>, scalar_prefetch = 0 : i64, scratch_operands = 0 : i64, tpu.core_type = #tpu.core_type<tc>, window_params = [{transform_indices = @transform_0, window_bounds = array<i64: 4, 1, 4, 64>}, {pipeline_mode = #tpu.pipeline_mode<synchronous>, transform_indices = @transform_1, window_bounds = array<i64: 4, 8, 4>}, {pipeline_mode = #tpu.pipeline_mode<synchronous>, transform_indices = @transform_2, window_bounds = array<i64: 8, 1>}, {transform_indices = @transform_3, window_bounds = array<i64: 1, 8, 64>}]} {
    %cst = arith.constant 0.000000e+00 : f32
    %0 = vector.broadcast %cst : f32 to vector<8x64xf32>
    %c0_i32 = arith.constant 0 : i32
    %1 = arith.index_cast %c0_i32 : i32 to index
    %c0 = arith.constant 0 : index
    %c0_0 = arith.constant 0 : index
    %c0_1 = arith.constant 0 : index
    %2 = vector.load %arg2[%1, %c0, %c0_0, %c0_1] : memref<4x1x4x64xf32, #tpu.memory_space<vmem>>, vector<1x1x4x64xf32>
    %3 = vector.shape_cast %2 : vector<1x1x4x64xf32> to vector<4x64xf32>
    %cst_2 = arith.constant dense<0.000000e+00> : vector<64xf32>
    %4 = vector.multi_reduction <add>, %3, %cst_2 [0] : vector<4x64xf32> to vector<64xf32>
    %5 = vector.shape_cast %4 : vector<64xf32> to vector<1x64xf32>
    %cst_3 = arith.constant 4.000000e+00 : f32
    %6 = vector.broadcast %cst_3 : f32 to vector<1x64xf32>
    %7 = arith.divf %5, %6 : vector<1x64xf32>
    %8 = vector.broadcast %7 : vector<1x64xf32> to vector<4x64xf32>
    %9 = arith.subf %3, %8 : vector<4x64xf32>
    %10 = arith.mulf %9, %9 : vector<4x64xf32>
    %cst_4 = arith.constant dense<0.000000e+00> : vector<64xf32>
    %11 = vector.multi_reduction <add>, %10, %cst_4 [0] : vector<4x64xf32> to vector<64xf32>
    %12 = vector.shape_cast %11 : vector<64xf32> to vector<1x64xf32>
    %cst_5 = arith.constant 4.000000e+00 : f32
    %13 = vector.broadcast %cst_5 : f32 to vector<1x64xf32>
    %14 = arith.divf %12, %13 : vector<1x64xf32>
    %cst_6 = arith.constant 9.99999974E-6 : f32
    %15 = vector.broadcast %cst_6 : f32 to vector<1x64xf32>
    %16 = arith.addf %14, %15 : vector<1x64xf32>
    %17 = math.rsqrt %16 : vector<1x64xf32>
    %18 = vector.broadcast %17 : vector<1x64xf32> to vector<4x64xf32>
    %19 = arith.mulf %9, %18 : vector<4x64xf32>
    %20 = arith.index_cast %c0_i32 : i32 to index
    %c0_7 = arith.constant 0 : index
    %c0_8 = arith.constant 0 : index
    %21 = vector.load %arg3[%20, %c0_7, %c0_8] : memref<4x8x4xf32, #tpu.memory_space<vmem>>, vector<1x8x4xf32>
    %22 = vector.shape_cast %21 : vector<1x8x4xf32> to vector<8x4xf32>
    %cst_9 = arith.constant dense<0.000000e+00> : vector<8x64xf32>
    %23 = tpu.matmul %22, %19, %cst_9 {dimension_numbers = #tpu.dot_dimension_numbers<[1], [0], [0], [1], [0, 0, 1, 1], [], []>} : vector<8x4xf32>, vector<4x64xf32>, vector<8x64xf32> -> vector<8x64xf32>
    %24 = arith.addf %0, %23 : vector<8x64xf32>
    %c1_i32 = arith.constant 1 : i32
    %25 = arith.index_cast %c1_i32 : i32 to index
    %c0_10 = arith.constant 0 : index
    %c0_11 = arith.constant 0 : index
    %c0_12 = arith.constant 0 : index
    %26 = vector.load %arg2[%25, %c0_10, %c0_11, %c0_12] : memref<4x1x4x64xf32, #tpu.memory_space<vmem>>, vector<1x1x4x64xf32>
    %27 = vector.shape_cast %26 : vector<1x1x4x64xf32> to vector<4x64xf32>
    %cst_13 = arith.constant dense<0.000000e+00> : vector<64xf32>
    %28 = vector.multi_reduction <add>, %27, %cst_13 [0] : vector<4x64xf32> to vector<64xf32>
    %29 = vector.shape_cast %28 : vector<64xf32> to vector<1x64xf32>
    %cst_14 = arith.constant 4.000000e+00 : f32
    %30 = vector.broadcast %cst_14 : f32 to vector<1x64xf32>
    %31 = arith.divf %29, %30 : vector<1x64xf32>
    %32 = vector.broadcast %31 : vector<1x64xf32> to vector<4x64xf32>
    %33 = arith.subf %27, %32 : vector<4x64xf32>
    %34 = arith.mulf %33, %33 : vector<4x64xf32>
    %cst_15 = arith.constant dense<0.000000e+00> : vector<64xf32>
    %35 = vector.multi_reduction <add>, %34, %cst_15 [0] : vector<4x64xf32> to vector<64xf32>
    %36 = vector.shape_cast %35 : vector<64xf32> to vector<1x64xf32>
    %cst_16 = arith.constant 4.000000e+00 : f32
    %37 = vector.broadcast %cst_16 : f32 to vector<1x64xf32>
    %38 = arith.divf %36, %37 : vector<1x64xf32>
    %cst_17 = arith.constant 9.99999974E-6 : f32
    %39 = vector.broadcast %cst_17 : f32 to vector<1x64xf32>
    %40 = arith.addf %38, %39 : vector<1x64xf32>
    %41 = math.rsqrt %40 : vector<1x64xf32>
    %42 = vector.broadcast %41 : vector<1x64xf32> to vector<4x64xf32>
    %43 = arith.mulf %33, %42 : vector<4x64xf32>
    %44 = arith.index_cast %c1_i32 : i32 to index
    %c0_18 = arith.constant 0 : index
    %c0_19 = arith.constant 0 : index
    %45 = vector.load %arg3[%44, %c0_18, %c0_19] : memref<4x8x4xf32, #tpu.memory_space<vmem>>, vector<1x8x4xf32>
    %46 = vector.shape_cast %45 : vector<1x8x4xf32> to vector<8x4xf32>
    %cst_20 = arith.constant dense<0.000000e+00> : vector<8x64xf32>
    %47 = tpu.matmul %46, %43, %cst_20 {dimension_numbers = #tpu.dot_dimension_numbers<[1], [0], [0], [1], [0, 0, 1, 1], [], []>} : vector<8x4xf32>, vector<4x64xf32>, vector<8x64xf32> -> vector<8x64xf32>
    %48 = arith.addf %24, %47 : vector<8x64xf32>
    %c2_i32 = arith.constant 2 : i32
    %49 = arith.index_cast %c2_i32 : i32 to index
    %c0_21 = arith.constant 0 : index
    %c0_22 = arith.constant 0 : index
    %c0_23 = arith.constant 0 : index
    %50 = vector.load %arg2[%49, %c0_21, %c0_22, %c0_23] : memref<4x1x4x64xf32, #tpu.memory_space<vmem>>, vector<1x1x4x64xf32>
    %51 = vector.shape_cast %50 : vector<1x1x4x64xf32> to vector<4x64xf32>
    %cst_24 = arith.constant dense<0.000000e+00> : vector<64xf32>
    %52 = vector.multi_reduction <add>, %51, %cst_24 [0] : vector<4x64xf32> to vector<64xf32>
    %53 = vector.shape_cast %52 : vector<64xf32> to vector<1x64xf32>
    %cst_25 = arith.constant 4.000000e+00 : f32
    %54 = vector.broadcast %cst_25 : f32 to vector<1x64xf32>
    %55 = arith.divf %53, %54 : vector<1x64xf32>
    %56 = vector.broadcast %55 : vector<1x64xf32> to vector<4x64xf32>
    %57 = arith.subf %51, %56 : vector<4x64xf32>
    %58 = arith.mulf %57, %57 : vector<4x64xf32>
    %cst_26 = arith.constant dense<0.000000e+00> : vector<64xf32>
    %59 = vector.multi_reduction <add>, %58, %cst_26 [0] : vector<4x64xf32> to vector<64xf32>
    %60 = vector.shape_cast %59 : vector<64xf32> to vector<1x64xf32>
    %cst_27 = arith.constant 4.000000e+00 : f32
    %61 = vector.broadcast %cst_27 : f32 to vector<1x64xf32>
    %62 = arith.divf %60, %61 : vector<1x64xf32>
    %cst_28 = arith.constant 9.99999974E-6 : f32
    %63 = vector.broadcast %cst_28 : f32 to vector<1x64xf32>
    %64 = arith.addf %62, %63 : vector<1x64xf32>
    %65 = math.rsqrt %64 : vector<1x64xf32>
    %66 = vector.broadcast %65 : vector<1x64xf32> to vector<4x64xf32>
    %67 = arith.mulf %57, %66 : vector<4x64xf32>
    %68 = arith.index_cast %c2_i32 : i32 to index
    %c0_29 = arith.constant 0 : index
    %c0_30 = arith.constant 0 : index
    %69 = vector.load %arg3[%68, %c0_29, %c0_30] : memref<4x8x4xf32, #tpu.memory_space<vmem>>, vector<1x8x4xf32>
    %70 = vector.shape_cast %69 : vector<1x8x4xf32> to vector<8x4xf32>
    %cst_31 = arith.constant dense<0.000000e+00> : vector<8x64xf32>
    %71 = tpu.matmul %70, %67, %cst_31 {dimension_numbers = #tpu.dot_dimension_numbers<[1], [0], [0], [1], [0, 0, 1, 1], [], []>} : vector<8x4xf32>, vector<4x64xf32>, vector<8x64xf32> -> vector<8x64xf32>
    %72 = arith.addf %48, %71 : vector<8x64xf32>
    %c3_i32 = arith.constant 3 : i32
    %73 = arith.index_cast %c3_i32 : i32 to index
    %c0_32 = arith.constant 0 : index
    %c0_33 = arith.constant 0 : index
    %c0_34 = arith.constant 0 : index
    %74 = vector.load %arg2[%73, %c0_32, %c0_33, %c0_34] : memref<4x1x4x64xf32, #tpu.memory_space<vmem>>, vector<1x1x4x64xf32>
    %75 = vector.shape_cast %74 : vector<1x1x4x64xf32> to vector<4x64xf32>
    %cst_35 = arith.constant dense<0.000000e+00> : vector<64xf32>
    %76 = vector.multi_reduction <add>, %75, %cst_35 [0] : vector<4x64xf32> to vector<64xf32>
    %77 = vector.shape_cast %76 : vector<64xf32> to vector<1x64xf32>
    %cst_36 = arith.constant 4.000000e+00 : f32
    %78 = vector.broadcast %cst_36 : f32 to vector<1x64xf32>
    %79 = arith.divf %77, %78 : vector<1x64xf32>
    %80 = vector.broadcast %79 : vector<1x64xf32> to vector<4x64xf32>
    %81 = arith.subf %75, %80 : vector<4x64xf32>
    %82 = arith.mulf %81, %81 : vector<4x64xf32>
    %cst_37 = arith.constant dense<0.000000e+00> : vector<64xf32>
    %83 = vector.multi_reduction <add>, %82, %cst_37 [0] : vector<4x64xf32> to vector<64xf32>
    %84 = vector.shape_cast %83 : vector<64xf32> to vector<1x64xf32>
    %cst_38 = arith.constant 4.000000e+00 : f32
    %85 = vector.broadcast %cst_38 : f32 to vector<1x64xf32>
    %86 = arith.divf %84, %85 : vector<1x64xf32>
    %cst_39 = arith.constant 9.99999974E-6 : f32
    %87 = vector.broadcast %cst_39 : f32 to vector<1x64xf32>
    %88 = arith.addf %86, %87 : vector<1x64xf32>
    %89 = math.rsqrt %88 : vector<1x64xf32>
    %90 = vector.broadcast %89 : vector<1x64xf32> to vector<4x64xf32>
    %91 = arith.mulf %81, %90 : vector<4x64xf32>
    %92 = arith.index_cast %c3_i32 : i32 to index
    %c0_40 = arith.constant 0 : index
    %c0_41 = arith.constant 0 : index
    %93 = vector.load %arg3[%92, %c0_40, %c0_41] : memref<4x8x4xf32, #tpu.memory_space<vmem>>, vector<1x8x4xf32>
    %94 = vector.shape_cast %93 : vector<1x8x4xf32> to vector<8x4xf32>
    %cst_42 = arith.constant dense<0.000000e+00> : vector<8x64xf32>
    %95 = tpu.matmul %94, %91, %cst_42 {dimension_numbers = #tpu.dot_dimension_numbers<[1], [0], [0], [1], [0, 0, 1, 1], [], []>} : vector<8x4xf32>, vector<4x64xf32>, vector<8x64xf32> -> vector<8x64xf32>
    %96 = arith.addf %72, %95 : vector<8x64xf32>
    %c4_i32 = arith.constant 4 : i32
    %c0_43 = arith.constant 0 : index
    %c0_44 = arith.constant 0 : index
    %97 = vector.load %arg4[%c0_43, %c0_44] : memref<8x1xf32, #tpu.memory_space<vmem>>, vector<8x1xf32>
    %98 = vector.broadcast %97 : vector<8x1xf32> to vector<8x64xf32>
    %99 = arith.addf %96, %98 : vector<8x64xf32>
    %c0_45 = arith.constant 0 : index
    %c0_46 = arith.constant 0 : index
    %c0_47 = arith.constant 0 : index
    %100 = vector.load %arg5[%c0_45, %c0_46, %c0_47] : memref<1x8x64xf32, #tpu.memory_space<vmem>>, vector<1x8x64xf32>
    %101 = vector.shape_cast %100 : vector<1x8x64xf32> to vector<8x64xf32>
    %102 = vector.shape_cast %99 : vector<8x64xf32> to vector<1x8x64xf32>
    tpu.vector_store %arg5[%c0_45, %c0_46, %c0_47], %102 {strides = array<i32>} : memref<1x8x64xf32, #tpu.memory_space<vmem>>, vector<1x8x64xf32>,
    return
  }
  func.func @transform_0(%arg0: i32, %arg1: i32) -> (i32, i32, i32, i32) {
    %c0_i32 = arith.constant 0 : i32
    %c0_i32_0 = arith.constant 0 : i32
    %c0_i32_1 = arith.constant 0 : i32
    return %c0_i32, %arg0, %c0_i32_0, %arg1 : i32, i32, i32, i32
  }
  func.func @transform_1(%arg0: i32, %arg1: i32) -> (i32, i32, i32) {
    %c0_i32 = arith.constant 0 : i32
    %c0_i32_0 = arith.constant 0 : i32
    %c0_i32_1 = arith.constant 0 : i32
    %c0_i32_2 = arith.constant 0 : i32
    return %c0_i32, %c0_i32_0, %c0_i32_1 : i32, i32, i32
  }
  func.func @transform_2(%arg0: i32, %arg1: i32) -> (i32, i32) {
    %c0_i32 = arith.constant 0 : i32
    %c0_i32_0 = arith.constant 0 : i32
    %c0_i32_1 = arith.constant 0 : i32
    return %c0_i32, %c0_i32_0 : i32, i32
  }
  func.func @transform_3(%arg0: i32, %arg1: i32) -> (i32, i32, i32) {
    %c0_i32 = arith.constant 0 : i32
    %c0_i32_0 = arith.constant 0 : i32
    return %arg0, %c0_i32, %arg1 : i32, i32, i32
  }
}

</mosaic_0001>

<bundles_post_ra>
// kernel: tpu_custom_call.1
= control target key start
LH: loop header
LB: loop body
LE: loop exit
PB: predicated region body
PF: predicated region fallthrough
CT: control target
= control target key end

     0   :  { %8 = vsyncpa [#allocation4], 0  ;;  %s1124_s0 = inlined_call_operand.vmem [shape: f32[4,2,4,64], index: 0, kind: input, shape index: {}]   ;;  %s1125_s1 = inlined_call_operand.vmem [shape: f32[4,8,4], index: 1, kind: input, shape index: {}]   ;;  %s1126_s2 = inlined_call_operand.vmem [shape: f32[8,1], index: 2, kind: input, shape index: {}]   ;;  %s1127_s3 = inlined_call_operand.hbm [shape: f32[2,8,64], index: 3, kind: output, shape index: {}]  }
   0x1   :  { %10 = vsyncpa [#allocation4 + $0x1], 0  ;;  %s972_s12 = smov 0   ;;  %s974_s13 = smov 0  }
   0x2   :  { %s976_s14 = smov 0   ;;  %s978_s15 = smov 0  }
   0x3   :  { %s980_s16 = smov 0   ;;  %s982_s17 = smov 0  }
   0x4 LB: > { %s748_s18 = sadd.s32 4294967295, %s946_s17   ;;  %s749_s19 = sadd.s32 4294967294, %s946_s17   ;;  %s946_s17 = sphi %s982_s17, %s16_s17   ;;  %s942_s16 = sphi %s980_s16, %s1136_s16   ;;  %s938_s15 = sphi %s978_s15, %s1135_s15   ;;  %s934_s14 = sphi %s976_s14, %s1134_s14   ;;  %s930_s13 = sphi %s974_s13, %s1133_s13   ;;  %s926_s12 = sphi %s972_s12, %s1132_s12  }
   0x5   : > { %s28_s20 = sadd.s32 1, %s942_s16  ;;  %s37_s21 = sadd.s32 1, %s934_s14 }
   0x6   : > { %p30_p0 = scmp.ge.s32.totalorder %s28_s20, 2  ;;  %p44_p1 = scmp.ne.s32.totalorder %s934_s14, %s930_s13 }
   0x7   : > { %p45_p2 = scmp.eq.s32.totalorder %s946_s17, 0  ;;  %p118_p3 = scmp.eq.s32.totalorder %s748_s18, 1 }
   0x8   : > { %s1138_s20 = smov (%p30_p0, %s28_s20), 0  ;;  %p123_p6 = scmp.ne.s32.totalorder %s930_s13, %s926_s12 }
   0x9   : > { %p46_p4 = por %p45_p2, %p44_p1  ;;  %p1011_p5 = por %p118_p3, %p44_p1 }
   0xa   : > { %s32_s23 = ssub.s32 %s942_s16, %s1138_s20  ;;  %p124_p8 = scmp.eq.s32.totalorder %s749_s19, 1 }
   0xb   : > { %p35_p7 = scmp.eq.s32.totalorder %s32_s23, 0  ;;  %p1128_p10 = scmp.ge.s32.totalorder %s946_s17, 2 }
   0xc   : > { %p1022_p9 = por %p124_p8, %p123_p6 }
   0xd   : > { %s1020_s24 = scalar_select %p35_p7, %s934_s14, %s37_s21  }
   0xe   : > { %146 = sbr.rel (%p1128_p10) target bundleno = 25 (0x19), region = 24 }
  0x13   : > { %149 = sbr.rel (!%p46_p4) target bundleno = 25 (0x19), region = 28  ;;  %s151_s26 = sand.u32 (%p46_p4), 1, %s934_s14  }
  0x14   : > { %s753_s27 = sshll.u32 (%p46_p4), %s942_s16, 2  ;;  %s752_s28 = sshll.u32 (%p46_p4), %s151_s26, 4 }
  0x15   : > { %s156_s4 = scalar_lea.vmem (%p46_p4), %s1124_s0, %s753_s27  ;;  %s153_s5 = scalar_lea.vmem (%p46_p4), [#allocation2], %s752_s28 }
  0x16   : > { %v173_v0 = vld [vmem:[%s156_s4] sm:$0xf] (%p46_p4)  ;;  %v175_v1 = vld [vmem:[%s156_s4 + $0x8] sm:$0xf] (%p46_p4)  ;;  %v177_v2 = vld [vmem:[%s156_s4 + $0x10] sm:$0xf] (%p46_p4) }
  0x17   : > { %174 = vst [vmem:[%s153_s5] sm:$0xf] (%p46_p4), %v173_v0  ;;  %176 = vst [vmem:[%s153_s5 + $0x4] sm:$0xf] (%p46_p4), %v175_v1  ;;  %v179_v3 = vld [vmem:[%s156_s4 + $0x18] sm:$0xf] (%p46_p4) }
  0x18   : > { %178 = vst [vmem:[%s153_s5 + $0x8] sm:$0xf] %v177_v2  ;;  %180 = vst [vmem:[%s153_s5 + $0xc] sm:$0xf] %v179_v3 }
  0x19 PF: > { %p754_p11 = scmp.ge.s32.totalorder %s946_s17, 1  ;;  %p211_p12 = scmp.lt.s32.totalorder %s946_s17, 3 }
  0x1b   : > { %p212_p13 = pnand %p754_p11, %p211_p12 }
  0x1c   : > { %s1037_s6 = sand.u32 (!%p212_p13), 1, %s930_s13   ;;  %s772_s30 = sshll.u32 (!%p212_p13), %s938_s15, 7 }
  0x1d   : > { %215 = sbr.rel (%p212_p13) target bundleno = 305 (0x131), region = 69  ;;  %s755_s7 = sshll.u32 (!%p212_p13), %s1037_s6, 4 }
  0x1e   : > { %s220_s10 = scalar_lea.vmem (!%p212_p13), [#allocation2], %s755_s7  ;;  %s756_s29 = sshll.u32 (!%p212_p13), %s1037_s6, 3 }
  0x1f   : > { %s240_s4 = scalar_lea.vmem (!%p212_p13), [#allocation3], %s756_s29  ;;  %s671_s9 = scalar_lea.hbm (!%p212_p13), %s1127_s3, %s772_s30 }
  0x20   : > { %s673_s5 = sshll.u32 (!%p212_p13), %s240_s4, 4  ;;  %s951_s18 = smov (!%p212_p13), [#allocation3]   ;;  %s674_s5 = int_to_ptr.vmem [resolvable:$true] %s673_s5 }
  0x21   : > { %s870_s11 = scalar_lea.vmem (!%p212_p13), %s674_s5, 128  ;;  %s874_s15 = sshll.u32 (!%p212_p13), %s951_s18, 4  ;;  %s875_s15 = int_to_ptr.vmem [resolvable:$false] %s874_s15 }
  0x22   : > { %v948_v4 = vmov 0.0   ;;  %vm242_vm0 = vcmask 519168   ;;  %vm949_vm1 = vmmov 0   ;;  %v649_v5 = vld [vmem:[%s1126_s2] sm:$0xff]  ;;  %v763_v8 = vld [vmem:[%s220_s10 + $0x8] sm:$0xf]  ;;  %p871_p0 = scmp.ne.s32.totalorder %s674_s5, %s870_s11  ;;  %p877_p3 = scmp.lt.s32.totalorder %s674_s5, %s875_s15 }
  0x23   : > { %783 = vmatprep.subr.mxu0 %v948_v4  ;;  %785 = vmatprep.mubr.msk.f32.mxu0 %vm949_vm1, %v948_v4  ;;  %v757_v6 = vld [vmem:[%s220_s10 + $0x4] sm:$0xf]  ;;  %v241_v7 = vld [vmem:[%s220_s10] sm:$0xf]  ;;  %v950_v9 = vmov 0   ;;  %v447_v12 = vsel %vm242_vm0, %v763_v8, 0.0 }
  0x24   : > { %788 = vmatprep.subr.mxu1 %v948_v4  ;;  %790 = vmatprep.mubr.msk.f32.mxu1 %vm949_vm1, %v948_v4  ;;  %v268_v10 = vsel %vm242_vm0, %v757_v6, 0.0  ;;  %v243_v11 = vsel %vm242_vm0, %v241_v7, 0.0  ;;  %v767_v13 = vld [vmem:[%s220_s10 + $0xc] sm:$0xf]  ;;  %v448_v16 = vrot.slane %v447_v12, 4  ;;  %vm295_vm2 = vcmask 1043456   ;;  %p872_p1 = pnand %p871_p0, %p1011_p5 }
  0x25   : > { %861 = vset.pattern.permute.xlu0 %v950_v9  ;;  %v269_v14 = vrot.slane %v268_v10, 4  ;;  %v244_v15 = vrot.slane %v243_v11, 4  ;;  %v549_v17 = vsel %vm242_vm0, %v767_v13, 0.0  ;;  %vm291_vm3 = vcmask 31744   ;;  %s659_s10 = scalar_lea.sflag [#allocation4], %s1037_s6  ;;  %s876_s19 = scalar_lea.vmem %s875_s15, 256 }
  0x26   : > { %652 = vperm.xlu0 %861, %v649_v5   ;;  %v550_v18 = vrot.slane %v549_v17, 4  ;;  %v449_v21 = vadd.f32 %v448_v16, %v447_v12  ;;  %vm656_vm4 = vcmask 523264   ;;  %p873_p2 = pneg %p872_p1  ;;  %p878_p4 = scmp.lt.s32.totalorder %s876_s19, %s870_s11 }
  0x27   : > { %v270_v19 = vadd.f32 %v269_v14, %v268_v10  ;;  %v245_v20 = vadd.f32 %v244_v15, %v243_v11 }
  0x28   : > { %v551_v22 = vadd.f32 %v550_v18, %v549_v17  ;;  %v450_v25 = vrot.slane %v449_v21, 2  ;;  %p879_p6 = por %p878_p4, %p877_p3 }
  0x29   : > { %v271_v23 = vrot.slane %v270_v19, 2  ;;  %v246_v24 = vrot.slane %v245_v20, 2 }
  0x2a   : > { %v552_v26 = vrot.slane %v551_v22, 2  ;;  %v451_v29 = vadd.f32 %v450_v25, %v449_v21  ;;  %p880_p7 = pnand %p879_p6, %p873_p2 }
  0x2b   : > { %v272_v27 = vadd.f32 %v271_v23, %v270_v19  ;;  %v247_v28 = vadd.f32 %v246_v24, %v245_v20 }
  0x2c   : > { %v553_v30 = vadd.f32 %v552_v26, %v551_v22  ;;  %v452_v33 = vrot.slane %v451_v29, 1 }
  0x2d   : > { %v273_v31 = vrot.slane %v272_v27, 1  ;;  %v248_v32 = vrot.slane %v247_v28, 1 }
  0x2e   : > { %v554_v34 = vrot.slane %v553_v30, 1  ;;  %v453_v37 = vadd.f32 %v452_v33, %v451_v29 }
  0x2f   : > { %v274_v35 = vadd.f32 %v273_v31, %v272_v27  ;;  %v249_v36 = vadd.f32 %v248_v32, %v247_v28  ;;  %v758_v27 = vld [vmem:[%s1125_s1 + $0x8] sm:$0xff] }
  0x30   : > { %v555_v38 = vadd.f32 %v554_v34, %v553_v30  ;;  %v454_v41 = vmul.f32 0.25, %v453_v37  ;;  %v265_v30 = vld [vmem:[%s1125_s1] sm:$0xff]  ;;  %v764_v34 = vld [vmem:[%s1125_s1 + $0x10] sm:$0xff] }
  0x31   : > { %v275_v39 = vmul.f32 0.25, %v274_v35  ;;  %v251_v40 = vmul.f32 0.25, %v249_v36  ;;  %v768_v35 = vld [vmem:[%s1125_s1 + $0x18] sm:$0xff] }
  0x32   : > { %v556_v42 = vmul.f32 0.25, %v555_v38  ;;  %v455_v45 = vsub.f32 %v763_v8, %v454_v41 }
  0x33   : > { %v276_v43 = vsub.f32 %v757_v6, %v275_v39  ;;  %v252_v44 = vsub.f32 %v241_v7, %v251_v40 }
  0x34   : > { %v557_v46 = vsub.f32 %v767_v13, %v556_v42  ;;  %v456_v49 = vmul.f32 %v455_v45, %v455_v45 }
  0x35   : > { %v277_v47 = vmul.f32 %v276_v43, %v276_v43  ;;  %v253_v48 = vmul.f32 %v252_v44, %v252_v44 }
  0x36   : > { %v558_v50 = vmul.f32 %v557_v46, %v557_v46  ;;  %v457_v53 = vsel %vm242_vm0, %v456_v49, 0.0 }
  0x37   : > { %v278_v51 = vsel %vm242_vm0, %v277_v47, 0.0  ;;  %v254_v52 = vsel %vm242_vm0, %v253_v48, 0.0  ;;  %v458_v56 = vrot.slane %v457_v53, 4 }
  0x38   : > { %v279_v54 = vrot.slane %v278_v51, 4  ;;  %v255_v55 = vrot.slane %v254_v52, 4  ;;  %v559_v57 = vsel %vm242_vm0, %v558_v50, 0.0 }
  0x39   : > { %v560_v58 = vrot.slane %v559_v57, 4  ;;  %v459_v61 = vadd.f32 %v458_v56, %v457_v53 }
  0x3a   : > { %v280_v59 = vadd.f32 %v279_v54, %v278_v51  ;;  %v256_v60 = vadd.f32 %v255_v55, %v254_v52 }
  0x3b   : > { %v561_v62 = vadd.f32 %v560_v58, %v559_v57  ;;  %v460_v1 = vrot.slane %v459_v61, 2 }
  0x3c   : > { %v281_v63 = vrot.slane %v280_v59, 2  ;;  %v257_v0 = vrot.slane %v256_v60, 2 }
  0x3d   : > { %v562_v2 = vrot.slane %v561_v62, 2  ;;  %v461_v6 = vadd.f32 %v460_v1, %v459_v61 }
  0x3e   : > { %v282_v3 = vadd.f32 %v281_v63, %v280_v59  ;;  %v258_v5 = vadd.f32 %v257_v0, %v256_v60 }
  0x3f   : > { %v563_v7 = vadd.f32 %v562_v2, %v561_v62  ;;  %v462_v10 = vrot.slane %v461_v6, 1 }
  0x40   : > { %v283_v8 = vrot.slane %v282_v3, 1  ;;  %v259_v9 = vrot.slane %v258_v5, 1 }
  0x41   : > { %v564_v11 = vrot.slane %v563_v7, 1  ;;  %v463_v14 = vadd.f32 %v462_v10, %v461_v6 }
  0x42   : > { %v284_v12 = vadd.f32 %v283_v8, %v282_v3  ;;  %v260_v13 = vadd.f32 %v259_v9, %v258_v5 }
  0x43   : > { %v565_v15 = vadd.f32 %v564_v11, %v563_v7  ;;  %v464_v18 = vmul.f32 0.25, %v463_v14 }
  0x44   : > { %v285_v16 = vmul.f32 0.25, %v284_v12  ;;  %v261_v17 = vmul.f32 0.25, %v260_v13 }
  0x45   : > { %v566_v19 = vmul.f32 0.25, %v565_v15  ;;  %v465_v22 = vadd.f32 1e-05, %v464_v18 }
  0x46   : > { %v286_v20 = vadd.f32 1e-05, %v285_v16  ;;  %v262_v21 = vadd.f32 1e-05, %v261_v17 }
  0x47   : > { %v567_v23 = vadd.f32 1e-05, %v566_v19 }
  0x48   : > { %862 = vrsqrt.f32 %v286_v20 }
  0x49   : > { %864 = vrsqrt.f32 %v262_v21 }
  0x4a   : > { %866 = vrsqrt.f32 %v465_v22 }
  0x4b   : > { %868 = vrsqrt.f32 %v567_v23 }
  0x55   : > { %v863_v24 = vpop.eup %862 }
  0x56   : > { %v865_v25 = vpop.eup %864  ;;  %v288_v26 = vmul.f32 %v863_v24, %v276_v43 }
  0x57   : > { %v867_v28 = vpop.eup %866  ;;  %v264_v29 = vmul.f32 %v865_v25, %v252_v44 }
  0x58   : > { %v869_v31 = vpop.eup %868  ;;  %784 = vmatpush3.msk.msra.mxu0 %vm295_vm2, %v288_v26  ;;  %v467_v32 = vmul.f32 %v867_v28, %v455_v45 }
  0x59   : > { %786 = vmatmul.mubr.msk.f32.vlgmr.msra.gmra.mxu0 %vm291_vm3, %v758_v27  ;;  %789 = vmatpush3.msk.msra.mxu1 %vm295_vm2, %v264_v29  ;;  %v569_v33 = vmul.f32 %v869_v31, %v557_v46 }
  0x5a   : > { %793 = vmatprep.subr.mxu0 %v948_v4  ;;  %791 = vmatmul.mubr.msk.f32.vlgmr.msra.gmra.mxu1 %vm291_vm3, %v265_v30 }
  0x5b   : > { %794 = vmatpush3.msk.msra.mxu0 %vm295_vm2, %v467_v32  ;;  %798 = vmatprep.subr.mxu1 %v948_v4 }
  0x5c   : > { %795 = vmatprep.mubr.msk.f32.mxu0 %vm949_vm1, %v948_v4  ;;  %799 = vmatpush3.msk.msra.mxu1 %vm295_vm2, %v569_v33 }
  0x5d   : > { %796 = vmatmul.mubr.msk.f32.vlgmr.msra.gmra.mxu0 %vm291_vm3, %v764_v34  ;;  %800 = vmatprep.mubr.msk.f32.mxu1 %vm949_vm1, %v948_v4 }
  0x5e   : > { %801 = vmatmul.mubr.msk.f32.vlgmr.msra.gmra.mxu1 %vm291_vm3, %v768_v35 }
  0xa1   : > { %v653_v45 = vpop.permute.xlu0 %652 }
 0x119   : > { %v365_v36 = vpop.f32.mrf.mxu0 }
 0x11a   : > { %v441_v37 = vpop.f32.mrf.mxu1 }
 0x11b   : > { %v787_v38 = vpop.f32.mrf.mxu0  ;;  %v442_v39 = vadd.f32 %v441_v37, %v365_v36 }
 0x11c   : > { %v792_v40 = vpop.f32.mrf.mxu1 }
 0x11d   : > { %v542_v41 = vpop.f32.mrf.mxu0 }
 0x11e   : > { %v546_v42 = vadd.f32 %v542_v41, %v442_v39  ;;  %v644_v43 = vpop.f32.mrf.mxu1 }
 0x11f   : > { %v797_v44 = vpop.f32.mrf.mxu0 }
 0x120   : > { %v648_v46 = vadd.f32 %v644_v43, %v546_v42  ;;  %v802_v4 = vpop.f32.mrf.mxu1 }
 0x122   : > { %v655_v47 = vadd.f32 %v653_v45, %v648_v46 }
 0x124   : > { %657 = vst.msk [vmem:[%s240_s4] sm:$0xff] %vm656_vm4, %v655_v47 }
 0x125   : > { %883 = shalt.err (!%p880_p7)
}
 0x126   : > { %s884_s21 = scalar_lea.hbm %s671_s9, 128  ;;  %s888_s26 = scalar_lea.hbm %s1127_s3, 256 }
 0x127   : > { %p885_p8 = scmp.ne.s32.totalorder %s671_s9, %s884_s21  ;;  %p889_p13 = scmp.lt.s32.totalorder %s671_s9, %s1127_s3 }
 0x128   : > { %p890_p0 = scmp.lt.s32.totalorder %s888_s26, %s884_s21 }
 0x129   : > { %p886_p11 = pnand %p885_p8, %p1011_p5 }
 0x12a   : > { %p891_p1 = por %p890_p0, %p889_p13 }
 0x12b   : > { %p887_p12 = pneg %p886_p11 }
 0x12d   : > { %p892_p10 = pnand %p891_p1, %p887_p12 }
 0x12f   : > { %895 = shalt.err (!%p892_p10)
}
 0x130   : > { %803 = dma.vmem_to_hbm [thread:$0]  (%p1011_p5), %s674_s5, 128, %s671_s9, %s659_s10  }
 0x131 PF: > { %s685_s29 = sand.u32 1, %s926_s12   ;;  %p1131_p2 = scmp.ge.s32.totalorder %s946_s17, 2 }
 0x132   : > { %s686_s30 = scalar_lea.sflag [#allocation4], %s685_s29 }
 0x133   : > { %p806_p3 = pnand %p1131_p2, %p1022_p9 }
 0x135   : > { %p807_p4 = pneg %p806_p3 }
 0x137   : > { %921 = dma.done.wait (%p807_p4), %s686_s30, 128  }
 0x138   : > { %923 = vsyncadd (%p807_p4), %s686_s30, 4294967168  ;;  %s16_s17 = sadd.s32 1, %s946_s17   ;;  %s1132_s12 = smov %s930_s13 }
 0x139   : > { %p13_p6 = scmp.ge.s32.totalorder %s16_s17, 4   ;;  %s1133_s13 = smov %s934_s14 }
 0x13a   : > { %s1134_s14 = smov %s1020_s24  ;;  %s1135_s15 = smov %s942_s16 }
 0x13b   : > { %s1136_s16 = smov %s1138_s20  ;;  %15 = sbr.rel (!%p13_p6) target bundleno = 4 (0x4), region = 119 }
 0x140   :  { %691 = vsyncpa [#allocation4], 1 }
 0x141   :  { %693 = vsyncpa [#allocation4 + $0x1], 1 }

</bundles_post_ra>
